<compile_context>
chip_gen: v7x
topology: tpu7x:2x2x1
jax: 0.10.0
libtpu: 0.0.40
codegen_flags: <defaults>
</compile_context>

<pallas_src>
import jax
import jax.numpy as jnp
from jax.experimental import pallas as pl
from jax.experimental.pallas import tpu as pltpu


def _hybrid_embed_proj_kernel(x_ref, w_ref, b_ref, o_ref):
    """One row-tile of: tokens @ W^T + b  (W pre-transposed on the host).

    x_ref: (tm, Cf) bf16 token rows
    w_ref: (Cf, D)  bf16 pre-transposed projection weight (resident)
    b_ref: (1, D)   f32 bias (resident)
    o_ref: (tm, D)  f32 output
    """
    acc = jnp.dot(x_ref[...], w_ref[...],
                  preferred_element_type=jnp.float32)      # MXU, f32 accumulate
    o_ref[...] = acc + b_ref[...]                          # f32 bias + store


def hybrid_embed(feature_map, proj_w, proj_b, *, block_rows=256):
    """HybridEmbed.forward, excluding the external CNN backbone.

    feature_map: (B, Cf, H, W) float32  -- backbone(x)[-1]
    proj_w:      (D, Cf) float32        -- nn.Linear weight (out_features, in_features)
    proj_b:      (D,)    float32
    returns      (B, H*W, D) float32
    """
    # TODO(synk): backbone(x)[-1] (arbitrary external CNN) has no Pallas
    # equivalent; this function consumes its final feature map directly.
    B, Cf, H, W = feature_map.shape
    D = proj_w.shape[0]
    N = H * W
    M = B * N

    # flatten(2).transpose(1, 2) + bf16 cast, fused by XLA into one host pass,
    # so the kernel sees a lane-dense bf16 (rows, Cf) slab (half the HBM read
    # of f32) and never pays an in-kernel XLU transpose.
    tokens = jnp.transpose(feature_map.reshape(B, Cf, N), (0, 2, 1))
    x2d = tokens.reshape(M, Cf).astype(jnp.bfloat16)

    # Row tile: multiple of 16 (bf16 sublane packing), capped by block_rows.
    tm = max(16, min(block_rows, M))
    tm = ((tm + 15) // 16) * 16
    # Prefer >= 2 grid steps when there are enough rows (megacore on v7x).
    if pl.cdiv(M, tm) < 2 and M >= 32:
        tm = ((pl.cdiv(M, 2) + 15) // 16) * 16

    m_pad = pl.cdiv(M, tm) * tm
    if m_pad != M:
        x2d = jnp.pad(x2d, ((0, m_pad - M), (0, 0)))

    # Host-side weight prep: transpose once, cast to bf16 (MXU-native RHS).
    w_t = proj_w.T.astype(jnp.bfloat16)                    # (Cf, D)
    b2 = proj_b.reshape(1, D).astype(jnp.float32)          # (1, D)

    out = pl.pallas_call(
        _hybrid_embed_proj_kernel,
        out_shape=jax.ShapeDtypeStruct((m_pad, D), jnp.float32),
        grid_spec=pltpu.PrefetchScalarGridSpec(
            num_scalar_prefetch=0,
            grid=(m_pad // tm,),
            in_specs=[
                pl.BlockSpec((tm, Cf), lambda i: (i, 0)),   # token rows (bf16)
                pl.BlockSpec((Cf, D), lambda i: (0, 0)),    # W^T (bf16), resident
                pl.BlockSpec((1, D), lambda i: (0, 0)),     # bias (f32), resident
            ],
            out_specs=pl.BlockSpec((tm, D), lambda i: (i, 0)),
        ),
        compiler_params=pltpu.CompilerParams(
            dimension_semantics=("parallel",)),
    )(x2d, w_t, b2)

    return out[:M].reshape(B, N, D)


def _reference(feature_map, proj_w, proj_b):
    """Pure-JAX (f32) reference matching the PyTorch forward."""
    B, Cf, H, W = feature_map.shape
    tokens = jnp.transpose(feature_map.reshape(B, Cf, H * W), (0, 2, 1))
    return tokens @ proj_w.T + proj_b


if __name__ == "__main__":
    # Small, module-consistent shapes: backbone output feature map
    # (B=2, feature_dim=32, 8x8 spatial) projected to embed_dim=128
    # (>=128 keeps the kernel output lane-dense).
    B, Cf, H, W = 2, 32, 8, 8
    D = 128

    key = jax.random.PRNGKey(0)
    k_feat, k_w, k_b = jax.random.split(key, 3)

    feature_map = jax.random.normal(k_feat, (B, Cf, H, W), jnp.float32)
    proj_w = 0.05 * jax.random.normal(k_w, (D, Cf), jnp.float32)
    proj_b = 0.05 * jax.random.normal(k_b, (D,), jnp.float32)

    # M = B*H*W = 128 rows; the tile heuristic picks tm=64 -> grid=(2,), so
    # both TensorCores get work on v7x.
    out = hybrid_embed(feature_map, proj_w, proj_b)
    out = jax.block_until_ready(out)

    ref = _reference(feature_map, proj_w, proj_b)
    # bf16 MXU operands with f32 accumulation -> loosened tolerance.
    assert out.shape == (B, H * W, D)
    assert jnp.allclose(out, ref, atol=2e-2, rtol=2e-2), (
        float(jnp.max(jnp.abs(out - ref))))

    print("KERNEL_OK")
</pallas_src>

<mosaic_0001>
module attributes {stable_mosaic.version = 11 : i64} {
  func.func @_hybrid_embed_proj_kernel(%arg0: i32, %arg1: memref<64x32xbf16, #tpu.memory_space<vmem>>, %arg2: memref<32x128xbf16, #tpu.memory_space<vmem>>, %arg3: memref<1x128xf32, #tpu.memory_space<vmem>>, %arg4: memref<64x128xf32, #tpu.memory_space<vmem>>) attributes {dimension_semantics = [#tpu.dimension_semantics<parallel>], iteration_bounds = array<i64: 2>, scalar_prefetch = 0 : i64, scratch_operands = 0 : i64, tpu.core_type = #tpu.core_type<tc>, window_params = [{transform_indices = @transform_0, window_bounds = array<i64: 64, 32>}, {pipeline_mode = #tpu.pipeline_mode<synchronous>, transform_indices = @transform_1, window_bounds = array<i64: 32, 128>}, {pipeline_mode = #tpu.pipeline_mode<synchronous>, transform_indices = @transform_2, window_bounds = array<i64: 1, 128>}, {transform_indices = @transform_3, window_bounds = array<i64: 64, 128>}]} {
    %c0 = arith.constant 0 : index
    %c0_0 = arith.constant 0 : index
    %0 = vector.load %arg1[%c0, %c0_0] : memref<64x32xbf16, #tpu.memory_space<vmem>>, vector<64x32xbf16>
    %c0_1 = arith.constant 0 : index
    %c0_2 = arith.constant 0 : index
    %1 = vector.load %arg2[%c0_1, %c0_2] : memref<32x128xbf16, #tpu.memory_space<vmem>>, vector<32x128xbf16>
    %cst = arith.constant dense<0.000000e+00> : vector<64x128xf32>
    %2 = tpu.matmul %0, %1, %cst {dimension_numbers = #tpu.dot_dimension_numbers<[1], [0], [0], [1], [0, 0, 1, 1], [], []>} : vector<64x32xbf16>, vector<32x128xbf16>, vector<64x128xf32> -> vector<64x128xf32>
    %c0_3 = arith.constant 0 : index
    %c0_4 = arith.constant 0 : index
    %3 = vector.load %arg3[%c0_3, %c0_4] : memref<1x128xf32, #tpu.memory_space<vmem>>, vector<1x128xf32>
    %4 = vector.broadcast %3 : vector<1x128xf32> to vector<64x128xf32>
    %5 = arith.addf %2, %4 : vector<64x128xf32>
    %c0_5 = arith.constant 0 : index
    %c0_6 = arith.constant 0 : index
    %6 = vector.load %arg4[%c0_5, %c0_6] : memref<64x128xf32, #tpu.memory_space<vmem>>, vector<64x128xf32>
    tpu.vector_store %arg4[%c0_5, %c0_6], %5 {strides = array<i32>} : memref<64x128xf32, #tpu.memory_space<vmem>>, vector<64x128xf32>,
    return
  }
  func.func @transform_0(%arg0: i32) -> (i32, i32) {
    %c0_i32 = arith.constant 0 : i32
    %c0_i32_0 = arith.constant 0 : i32
    return %arg0, %c0_i32 : i32, i32
  }
  func.func @transform_1(%arg0: i32) -> (i32, i32) {
    %c0_i32 = arith.constant 0 : i32
    %c0_i32_0 = arith.constant 0 : i32
    %c0_i32_1 = arith.constant 0 : i32
    return %c0_i32, %c0_i32_0 : i32, i32
  }
  func.func @transform_2(%arg0: i32) -> (i32, i32) {
    %c0_i32 = arith.constant 0 : i32
    %c0_i32_0 = arith.constant 0 : i32
    %c0_i32_1 = arith.constant 0 : i32
    return %c0_i32, %c0_i32_0 : i32, i32
  }
  func.func @transform_3(%arg0: i32) -> (i32, i32) {
    %c0_i32 = arith.constant 0 : i32
    %c0_i32_0 = arith.constant 0 : i32
    return %arg0, %c0_i32 : i32, i32
  }
}

</mosaic_0001>

<bundles_post_ra>
// kernel: tpu_custom_call.1
= control target key start
LH: loop header
LB: loop body
LE: loop exit
PB: predicated region body
PF: predicated region fallthrough
CT: control target
= control target key end

     0   :  { %8 = vsyncpa [#allocation3], 0  ;;  %s681_s0 = inlined_call_operand.vmem [shape: bf16[128,32], index: 0, kind: input, shape index: {}]   ;;  %s682_s1 = inlined_call_operand.vmem [shape: bf16[32,128], index: 1, kind: input, shape index: {}]   ;;  %s683_s2 = inlined_call_operand.vmem [shape: f32[1,128], index: 2, kind: input, shape index: {}]   ;;  %s684_s3 = inlined_call_operand.hbm [shape: f32[128,128], index: 3, kind: output, shape index: {}]  }
   0x1   :  { %10 = vsyncpa [#allocation3 + $0x1], 0  ;;  %s566_s12 = smov 0   ;;  %s568_s13 = smov 0  }
   0x2   :  { %s570_s14 = smov 0   ;;  %s572_s15 = smov 0  }
   0x3 LB: > { %s587_s16 = sadd.s32 4294967295, %s541_s15   ;;  %s386_s17 = sadd.s32 4294967294, %s541_s15   ;;  %s541_s15 = sphi %s572_s15, %s690_s15   ;;  %s537_s14 = sphi %s570_s14, %s689_s14   ;;  %s533_s13 = sphi %s568_s13, %s688_s13   ;;  %s529_s12 = sphi %s566_s12, %s687_s12  }
   0x4   : > { %s591_s18 = sadd.s32 1, %s541_s15   ;;  %s91_s19 = sadd.s32 1, %s537_s14 }
   0x5   : > { %s88_s20 = ssub.s32 %s541_s15, %s591_s18  ;;  %p101_p0 = scmp.ne.s32.totalorder %s537_s14, %s533_s13 }
   0x6   : > { %p89_p1 = scmp.eq.s32.totalorder %s88_s20, 0  ;;  %p102_p2 = scmp.eq.s32.totalorder %s587_s16, 1 }
   0x7   : > { %p107_p3 = scmp.ne.s32.totalorder %s533_s13, %s529_s12  ;;  %p108_p4 = scmp.eq.s32.totalorder %s386_s17, 1 }
   0x8   : > { %s602_s21 = scalar_select %p89_p1, %s537_s14, %s91_s19  }
   0x9   : > { %p604_p5 = por %p102_p2, %p101_p0  ;;  %p608_p6 = por %p108_p4, %p107_p3 }
   0xa   : > { %p389_p7 = scmp.ge.s32.totalorder %s541_s15, 1  ;;  %p141_p8 = scmp.lt.s32.totalorder %s541_s15, 3 }
   0xc   : > { %p142_p9 = pnand %p389_p7, %p141_p8 }
   0xd   : > { %v473_v0 = vld [vmem:[%s682_s1] sm:$0xff] (!%p142_p9)   ;;  %s391_s26 = sshll.u32 (!%p142_p9), %s587_s16, 3  ;;  %v474_v1 = vld [vmem:[%s682_s1 + $0x8] sm:$0xff] (!%p142_p9)   ;;  %vm224_vm0 = vcmask (!%p142_p9), 261120   ;;  %s162_s6 = sand.u32 (!%p142_p9), 1, %s533_s13  }
   0xe   : > { %145 = sbr.rel (%p142_p9) target bundleno = 258 (0x102), region = 32  ;;  %p166_p10 = scmp.lt.s32.totalorder (!%p142_p9), %s391_s26, 15  ;;  %416 = vmatprep.subr.bf16.mxu0 (!%p142_p9), %v473_v0  ;;  %428 = vmatprep.subr.bf16.mxu1 (!%p142_p9), %v473_v0  ;;  %v393_v6 = vld [vmem:[%s683_s2] ss:$0 sm:$0xff] (!%p142_p9) }
   0xf   : > { %417 = vmatpush3.bf16.msra.mxu0 (!%p142_p9), %v473_v0  ;;  %430 = vmatpush3.bf16.msra.mxu1 (!%p142_p9), %v473_v0  ;;  %s390_s7 = sshll.u32 (!%p142_p9), %s162_s6, 6  ;;  %s409_s10 = sshll.u32 (!%p142_p9), %s587_s16, 10 }
  0x10   : > { %418 = vmatprep.subr.bf16.mxu0 (!%p142_p9), %v474_v1  ;;  %429 = vmatprep.subr.bf16.mxu1 (!%p142_p9), %v474_v1  ;;  %s164_s11 = scalar_lea.vmem (!%p142_p9), [#allocation2], %s390_s7  ;;  %s634_s20 = scalar_lea.hbm (!%p142_p9), %s684_s3, %s409_s10 }
  0x11   : > { %s324_s17 = sshll.u32 (!%p142_p9), %s164_s11, 4  ;;  %s640_s24 = scalar_lea.sflag (!%p142_p9), [#allocation3], %s162_s6  ;;  %s636_s17 = int_to_ptr.vmem [resolvable:$true] %s324_s17 }
  0x12   : > { %s479_s25 = scalar_lea.vmem (!%p142_p9), %s636_s17, 1024 }
  0x13   : > { %419 = vmatpush3.bf16.msra.mxu0 (!%p142_p9), %v474_v1  ;;  %431 = vmatpush3.bf16.msra.mxu1 (!%p142_p9), %v474_v1  ;;  %p480_p11 = scmp.ne.s32.totalorder (!%p142_p9), %s636_s17, %s479_s25 }
  0x15   : > { %s692_s26 = smov (!%p166_p10, %s391_s26), 15  ;;  %p481_p12 = pnand %p480_p11, %p604_p5 }
  0x16   : > { %s392_s29 = sshll.u32 %s692_s26, 2  ;;  %s543_s26 = smov [#allocation2]  }
  0x17   : > { %s169_s5 = scalar_lea.vmem %s681_s0, %s392_s29  ;;  %p482_p13 = pneg %p481_p12 }
  0x18   : > { %v475_v2 = vld [vmem:[%s169_s5] sm:$0xff]   ;;  %v476_v3 = vld [vmem:[%s169_s5 + $0x10] sm:$0xff]   ;;  %v477_v4 = vld [vmem:[%s169_s5 + $0x8] sm:$0xff]   ;;  %s483_s27 = sshll.u32 %s543_s26, 4  ;;  %s484_s27 = int_to_ptr.vmem [resolvable:$false] %s483_s27 }
  0x19   : > { %420 = vmatprep.mubr.msk.bf16.mxu0 %vm224_vm0, %v475_v2  ;;  %424 = vmatprep.mubr.msk.bf16.mxu1 %vm224_vm0, %v476_v3  ;;  %v478_v5 = vld [vmem:[%s169_s5 + $0x18] sm:$0xff]   ;;  %s485_s28 = scalar_lea.vmem %s484_s27, 2048  ;;  %p486_p0 = scmp.lt.s32.totalorder %s636_s17, %s484_s27 }
  0x1a   : > { %421 = vmatmul.mubr.msk.bf16.vlgmr.msra.gmra.mrb[0].mxu0 %vm224_vm0, %v477_v4  ;;  %425 = vmatmul.mubr.msk.bf16.vlgmr.msra.gmra.mrb[0].mxu1 %vm224_vm0, %v478_v5  ;;  %p487_p1 = scmp.lt.s32.totalorder %s485_s28, %s479_s25 }
  0x1c   : > { %p488_p2 = por %p487_p1, %p486_p0 }
  0x1e   : > { %p489_p3 = pnand %p488_p2, %p482_p13 }
  0xed   : > { %v422_v7 = vpop.f32.mrb[0].mxu0  ;;  %v426_v9 = vpop.f32.mrb[0].mxu1 }
  0xee   : > { %v280_v8 = vadd.f32 %v422_v7, %v393_v6  ;;  %v271_v10 = vpop.f32.mrb[1].mxu0  ;;  %v296_v11 = vadd.f32 %v426_v9, %v393_v6  ;;  %v287_v13 = vpop.f32.mrb[1].mxu1 }
  0xef   : > { %v272_v12 = vadd.f32 %v393_v6, %v271_v10  ;;  %v423_v14 = vpop.f32.mrb[2].mxu0  ;;  %v288_v15 = vadd.f32 %v393_v6, %v287_v13  ;;  %v427_v17 = vpop.f32.mrb[2].mxu1 }
  0xf0   : > { %304 = vst [vmem:[%s164_s11 + $0x10] sm:$0xff] %v280_v8  ;;  %v283_v16 = vadd.f32 %v423_v14, %v393_v6  ;;  %v274_v18 = vpop.f32.mrb[3].mxu0  ;;  %308 = vst [vmem:[%s164_s11 + $0x30] sm:$0xff] %v296_v11  ;;  %v299_v19 = vadd.f32 %v427_v17, %v393_v6  ;;  %v290_v21 = vpop.f32.mrb[3].mxu1 }
  0xf1   : > { %302 = vst [vmem:[%s164_s11] sm:$0xff] %v272_v12  ;;  %v275_v20 = vadd.f32 %v393_v6, %v274_v18  ;;  %306 = vst [vmem:[%s164_s11 + $0x20] sm:$0xff] %v288_v15  ;;  %v291_v22 = vadd.f32 %v393_v6, %v290_v21 }
  0xf2   : > { %305 = vst [vmem:[%s164_s11 + $0x18] sm:$0xff] %v283_v16  ;;  %309 = vst [vmem:[%s164_s11 + $0x38] sm:$0xff] %v299_v19 }
  0xf3   : > { %303 = vst [vmem:[%s164_s11 + $0x8] sm:$0xff] %v275_v20  ;;  %307 = vst [vmem:[%s164_s11 + $0x28] sm:$0xff] %v291_v22 }
  0xf4   : > { %492 = shalt.err (!%p489_p3)
}
  0xf5   : > { %s493_s29 = scalar_lea.hbm %s634_s20, 1024  ;;  %s497_s5 = scalar_lea.hbm %s684_s3, 2048 }
  0xf6   : > { %p494_p4 = scmp.ne.s32.totalorder %s634_s20, %s493_s29  ;;  %p498_p9 = scmp.lt.u32.totalorder %s634_s20, %s684_s3 }
  0xf7   : > { %p499_p10 = scmp.lt.u32.totalorder %s497_s5, %s493_s29  ;;  %p501_p12 = scmp.lt.u32.totalorder %s493_s29, %s634_s20 }
  0xf8   : > { %p495_p7 = pnand %p494_p4, %p604_p5 }
  0xf9   : > { %p500_p11 = por %p499_p10, %p498_p9 }
  0xfa   : > { %p496_p8 = pneg %p495_p7 }
  0xfb   : > { %p502_p13 = por %p501_p12, %p500_p11 }
  0xfd   : > { %p503_p0 = pnand %p502_p13, %p496_p8 }
  0xff   : > { %506 = shalt.err (!%p503_p0)
}
 0x100   : > { %s544_s8 = smov 128   ;;  %s545_s9 = smov 8  }
 0x101   : > { %432 = dma.vmem_to_hbm [thread:$0]  (%p604_p5), %s636_s17, 1024, %s634_s20, %s640_s24, %s544_s8, %s544_s8, %s545_s9  }
 0x102 PF: > { %p438_p1 = scmp.ge.s32.totalorder %s541_s15, 2  ;;  %s339_s10 = sand.u32 1, %s529_s12  }
 0x103   : > { %s340_s11 = scalar_lea.sflag [#allocation3], %s339_s10 }
 0x104   : > { %p435_p2 = pnand %p438_p1, %p608_p6 }
 0x106   : > { %524 = dma.done.wait (!%p435_p2), %s340_s11, 1024  }
 0x107   : > { %526 = vsyncadd (!%p435_p2), %s340_s11, 4294966272  ;;  %p13_p3 = scmp.ge.s32.totalorder %s591_s18, 4   ;;  %s687_s12 = smov %s533_s13 }
 0x108   : > { %s688_s13 = smov %s537_s14  ;;  %s689_s14 = smov %s602_s21 }
 0x109   : > { %s690_s15 = smov %s591_s18  ;;  %15 = sbr.rel (!%p13_p3) target bundleno = 3 (0x3), region = 67 }
 0x110   :  { %345 = vsyncpa [#allocation3], 1 }
 0x111   :  { %347 = vsyncpa [#allocation3 + $0x1], 1 }

</bundles_post_ra>
